<compile_context>
chip_gen: v5e
topology: v5e:2x2
jax: 0.10.0
libtpu: 0.0.40
codegen_flags: <defaults>
</compile_context>

<pallas_src>
import jax
import jax.numpy as jnp
from jax.experimental import pallas as pl
from jax.experimental.pallas import tpu as pltpu

_EPS = 1e-6


# ----------------------------------------------------------------------------
# Pallas kernel: fused AdaLIN for a block of Bt images, each (C, HW)
# ----------------------------------------------------------------------------
def _adalin_kernel(rho_ref, x_ref, gamma_ref, beta_ref, out_ref):
    # rho_ref   : (1,)          SMEM scalar (already anime-resolved/clamped)
    # x_ref     : (Bt, C, HW)   VMEM, lane-dense (HW in lanes)
    # gamma_ref : (Bt, C, 1)
    # beta_ref  : (Bt, C, 1)
    # out_ref   : (Bt, C, HW)
    Bt, C, HW = x_ref.shape            # static block shape
    # NOTE: assumes HW > 1 and C*HW > 1 (unbiased variance), as in the module.

    # ---- Single stats sweep: per-channel sum and sum of squares (f32) ----
    xs = x_ref[...].astype(jnp.float32)                      # stats read
    s = jnp.sum(xs, axis=2, keepdims=True)                   # (Bt, C, 1)
    ss = jnp.sum(xs * xs, axis=2, keepdims=True)             # (Bt, C, 1)

    # Instance-norm stats (unbiased var, matches torch.var).
    ins_mean = s * (1.0 / HW)                                 # (Bt, C, 1)
    ins_var = (ss - s * ins_mean) * (1.0 / (HW - 1)) + _EPS
    ins_rstd = jax.lax.rsqrt(ins_var)

    # Layer-norm stats from the per-channel partial sums (length-C reduce).
    n_all = C * HW
    S = jnp.sum(s, axis=1, keepdims=True)                     # (Bt, 1, 1)
    SS = jnp.sum(ss, axis=1, keepdims=True)
    ln_mean = S * (1.0 / n_all)
    ln_var = (SS - S * ln_mean) * (1.0 / (n_all - 1)) + _EPS
    ln_rstd = jax.lax.rsqrt(ln_var)

    # ---- Fold rho blend + affine into a per-channel scale/shift ----
    rho = rho_ref[0]
    gamma = gamma_ref[...].astype(jnp.float32)                # (Bt, C, 1)
    beta = beta_ref[...].astype(jnp.float32)

    a = rho * ins_rstd + (1.0 - rho) * ln_rstd                          # (Bt,C,1)
    m = rho * (ins_mean * ins_rstd) + (1.0 - rho) * (ln_mean * ln_rstd)  # (Bt,C,1)
    scale = gamma * a
    shift = beta - gamma * m

    # ---- Apply phase: one FMA per element (re-read x_ref to bound live range)
    out_ref[...] = (x_ref[...].astype(jnp.float32) * scale + shift
                    ).astype(out_ref.dtype)


# ----------------------------------------------------------------------------
# Wrapper
# ----------------------------------------------------------------------------
def _choose_batch_block(B, per_image_bytes, target_bytes=2 << 20):
    """Largest divisor of B whose block stays around ~target_bytes."""
    bt = 1
    for cand in range(1, B + 1):
        if B % cand == 0 and cand * per_image_bytes <= target_bytes:
            bt = cand
    return bt


def adalin_pallas(x_nchw, gamma, beta, rho_param, anime=False):
    """AdaLIN forward. x: (B,C,H,W); gamma/beta broadcastable to (B,C,1,1)."""
    B, C, H, W = x_nchw.shape
    HW = H * W
    itemsize = jnp.dtype(x_nchw.dtype).itemsize

    # anime branch is a static Python flag (module attribute) -> resolve here.
    rho = rho_param if anime else jnp.clip(rho_param - 0.1, 0.0, 1.0)
    rho = jnp.asarray(rho, jnp.float32).reshape(1)

    x2 = x_nchw.reshape(B, C, HW)                             # free, contiguous
    # Broadcast first so shared (1,C,1,1) or (C,) gamma/beta also work.
    g2 = jnp.broadcast_to(jnp.asarray(gamma, x_nchw.dtype), (B, C, 1, 1)
                          ).reshape(B, C, 1)
    b2 = jnp.broadcast_to(jnp.asarray(beta, x_nchw.dtype), (B, C, 1, 1)
                          ).reshape(B, C, 1)

    # Batch-block the grid so each step moves a reasonable amount of data.
    per_image_bytes = C * HW * itemsize
    Bt = _choose_batch_block(B, per_image_bytes)
    block_bytes = Bt * per_image_bytes

    # 2x in + 2x out double buffers + f32 temporaries + slack.
    vmem_limit = int(min(32 * 1024 * 1024,
                         max(4 * 1024 * 1024, 8 * block_bytes + (1 << 20))))

    out = pl.pallas_call(
        _adalin_kernel,
        out_shape=jax.ShapeDtypeStruct((B, C, HW), x_nchw.dtype),
        grid=(B // Bt,),
        in_specs=[
            pl.BlockSpec(memory_space=pltpu.MemorySpace.SMEM),        # rho
            pl.BlockSpec((Bt, C, HW), lambda i: (i, 0, 0)),           # x
            pl.BlockSpec((Bt, C, 1), lambda i: (i, 0, 0)),            # gamma
            pl.BlockSpec((Bt, C, 1), lambda i: (i, 0, 0)),            # beta
        ],
        out_specs=pl.BlockSpec((Bt, C, HW), lambda i: (i, 0, 0)),
        compiler_params=pltpu.CompilerParams(
            # Independent grid steps. (On v7x an explicit core-parallel split
            # over the batch axis would engage both TensorCores.)
            dimension_semantics=("parallel",),
            vmem_limit_bytes=vmem_limit,
        ),
    )(rho, x2, g2, b2)
    return out.reshape(B, C, H, W)


# ----------------------------------------------------------------------------
# Pure-JAX reference mirroring the PyTorch module exactly
# ----------------------------------------------------------------------------
def _reference_adalin(x, gamma, beta, rho_param, anime):
    b, c, h, w = x.shape
    xf = x.reshape(b, c, -1)
    ins_mean = xf.mean(axis=2).reshape(b, c, 1, 1)
    ins_var = xf.var(axis=2, ddof=1) + _EPS                  # torch.var unbiased
    ins_std = jnp.sqrt(ins_var).reshape(b, c, 1, 1)
    x_ins = (x - ins_mean) / ins_std

    xb = x.reshape(b, -1)
    ln_mean = xb.mean(axis=1).reshape(b, 1, 1, 1)
    ln_var = xb.var(axis=1, ddof=1).reshape(b, 1, 1, 1) + _EPS
    ln_std = jnp.sqrt(ln_var)
    x_ln = (x - ln_mean) / ln_std

    rho = rho_param if anime else jnp.clip(rho_param - 0.1, 0.0, 1.0)
    x_hat = rho * x_ins + (1 - rho) * x_ln
    g = jnp.broadcast_to(jnp.asarray(gamma), (b, c, 1, 1))
    bb = jnp.broadcast_to(jnp.asarray(beta), (b, c, 1, 1))
    return x_hat * g + bb


# ----------------------------------------------------------------------------
# Main
# ----------------------------------------------------------------------------
if __name__ == "__main__":
    key = jax.random.PRNGKey(0)
    k_x, k_g, k_b = jax.random.split(key, 3)

    # Small shapes consistent with the module: B=2, C=4, H=W=16 (H*W = 256,
    # a multiple of 128 -> lane-dense kernel tiles).
    B, C, H, W = 2, 4, 16, 16

    x = jax.random.normal(k_x, (B, C, H, W), dtype=jnp.float32)
    gamma = 1.0 + 0.1 * jax.random.normal(k_g, (B, C, 1, 1), jnp.float32)
    beta = 0.1 * jax.random.normal(k_b, (B, C, 1, 1), jnp.float32)
    rho_param = jnp.full((1,), 0.9, jnp.float32)   # nn.Parameter(1).fill_(0.9)

    ok = True
    for anime in (False, True):
        out = jax.block_until_ready(
            adalin_pallas(x, gamma, beta, rho_param, anime=anime))
        ref = jax.block_until_ready(
            _reference_adalin(x, gamma, beta, rho_param, anime))
        ok &= out.shape == (B, C, H, W)
        ok &= bool(jnp.allclose(out, ref, atol=1e-4, rtol=1e-4))

    # Shared (1,C,1,1) gamma/beta (broadcast path in the wrapper).
    g_shared = 1.0 + 0.1 * jax.random.normal(k_g, (1, C, 1, 1), jnp.float32)
    b_shared = 0.1 * jax.random.normal(k_b, (1, C, 1, 1), jnp.float32)
    out_s = jax.block_until_ready(
        adalin_pallas(x, g_shared, b_shared, rho_param, anime=False))
    ref_s = jax.block_until_ready(
        _reference_adalin(x, g_shared, b_shared, rho_param, False))
    ok &= bool(jnp.allclose(out_s, ref_s, atol=1e-4, rtol=1e-4))

    assert ok
    print("KERNEL_OK")
</pallas_src>

<mosaic_0001>
module attributes {stable_mosaic.version = 11 : i64} {
  func.func @_adalin_kernel(%arg0: i32, %arg1: memref<1xf32, #tpu.memory_space<smem>>, %arg2: memref<2x4x256xf32, #tpu.memory_space<vmem>>, %arg3: memref<2x4x1xf32, #tpu.memory_space<vmem>>, %arg4: memref<2x4x1xf32, #tpu.memory_space<vmem>>, %arg5: memref<2x4x256xf32, #tpu.memory_space<vmem>>) attributes {dimension_semantics = [#tpu.dimension_semantics<parallel>], iteration_bounds = array<i64: 1>, scalar_prefetch = 0 : i64, scratch_operands = 0 : i64, tpu.core_type = #tpu.core_type<tc>, window_params = [{transform_indices = @transform_0, window_bounds = array<i64: 1>}, {transform_indices = @transform_1, window_bounds = array<i64: 2, 4, 256>}, {transform_indices = @transform_2, window_bounds = array<i64: 2, 4, 1>}, {transform_indices = @transform_3, window_bounds = array<i64: 2, 4, 1>}, {transform_indices = @transform_4, window_bounds = array<i64: 2, 4, 256>}]} {
    %c0 = arith.constant 0 : index
    %c0_0 = arith.constant 0 : index
    %c0_1 = arith.constant 0 : index
    %0 = vector.load %arg2[%c0, %c0_0, %c0_1] : memref<2x4x256xf32, #tpu.memory_space<vmem>>, vector<2x4x256xf32>
    %cst = arith.constant dense<0.000000e+00> : vector<2x4xf32>
    %1 = vector.multi_reduction <add>, %0, %cst [2] : vector<2x4x256xf32> to vector<2x4xf32>
    %2 = vector.shape_cast %1 : vector<2x4xf32> to vector<2x4x1xf32>
    %3 = arith.mulf %0, %0 : vector<2x4x256xf32>
    %cst_2 = arith.constant dense<0.000000e+00> : vector<2x4xf32>
    %4 = vector.multi_reduction <add>, %3, %cst_2 [2] : vector<2x4x256xf32> to vector<2x4xf32>
    %5 = vector.shape_cast %4 : vector<2x4xf32> to vector<2x4x1xf32>
    %cst_3 = arith.constant 3.906250e-03 : f32
    %6 = vector.broadcast %cst_3 : f32 to vector<2x4x1xf32>
    %7 = arith.mulf %2, %6 : vector<2x4x1xf32>
    %8 = arith.mulf %2, %7 : vector<2x4x1xf32>
    %9 = arith.subf %5, %8 : vector<2x4x1xf32>
    %cst_4 = arith.constant 0.00392156886 : f32
    %10 = vector.broadcast %cst_4 : f32 to vector<2x4x1xf32>
    %11 = arith.mulf %9, %10 : vector<2x4x1xf32>
    %cst_5 = arith.constant 9.99999997E-7 : f32
    %12 = vector.broadcast %cst_5 : f32 to vector<2x4x1xf32>
    %13 = arith.addf %11, %12 : vector<2x4x1xf32>
    %14 = math.rsqrt %13 : vector<2x4x1xf32>
    %cst_6 = arith.constant dense<0.000000e+00> : vector<2x1xf32>
    %15 = vector.multi_reduction <add>, %2, %cst_6 [1] : vector<2x4x1xf32> to vector<2x1xf32>
    %16 = vector.shape_cast %15 : vector<2x1xf32> to vector<2x1x1xf32>
    %cst_7 = arith.constant dense<0.000000e+00> : vector<2x1xf32>
    %17 = vector.multi_reduction <add>, %5, %cst_7 [1] : vector<2x4x1xf32> to vector<2x1xf32>
    %18 = vector.shape_cast %17 : vector<2x1xf32> to vector<2x1x1xf32>
    %cst_8 = arith.constant 9.765625E-4 : f32
    %19 = vector.broadcast %cst_8 : f32 to vector<2x1x1xf32>
    %20 = arith.mulf %16, %19 : vector<2x1x1xf32>
    %21 = arith.mulf %16, %20 : vector<2x1x1xf32>
    %22 = arith.subf %18, %21 : vector<2x1x1xf32>
    %cst_9 = arith.constant 9.77517105E-4 : f32
    %23 = vector.broadcast %cst_9 : f32 to vector<2x1x1xf32>
    %24 = arith.mulf %22, %23 : vector<2x1x1xf32>
    %cst_10 = arith.constant 9.99999997E-7 : f32
    %25 = vector.broadcast %cst_10 : f32 to vector<2x1x1xf32>
    %26 = arith.addf %24, %25 : vector<2x1x1xf32>
    %27 = math.rsqrt %26 : vector<2x1x1xf32>
    %c0_11 = arith.constant 0 : index
    %28 = memref.load %arg1[%c0_11] : memref<1xf32, #tpu.memory_space<smem>>
    %c0_12 = arith.constant 0 : index
    %c0_13 = arith.constant 0 : index
    %c0_14 = arith.constant 0 : index
    %29 = vector.load %arg3[%c0_12, %c0_13, %c0_14] : memref<2x4x1xf32, #tpu.memory_space<vmem>>, vector<2x4x1xf32>
    %c0_15 = arith.constant 0 : index
    %c0_16 = arith.constant 0 : index
    %c0_17 = arith.constant 0 : index
    %30 = vector.load %arg4[%c0_15, %c0_16, %c0_17] : memref<2x4x1xf32, #tpu.memory_space<vmem>>, vector<2x4x1xf32>
    %31 = vector.broadcast %28 : f32 to vector<2x4x1xf32>
    %32 = arith.mulf %31, %14 : vector<2x4x1xf32>
    %cst_18 = arith.constant 1.000000e+00 : f32
    %33 = arith.subf %cst_18, %28 : f32
    %34 = vector.broadcast %33 : f32 to vector<2x1x1xf32>
    %35 = arith.mulf %34, %27 : vector<2x1x1xf32>
    %36 = vector.broadcast %35 : vector<2x1x1xf32> to vector<2x4x1xf32>
    %37 = arith.addf %32, %36 : vector<2x4x1xf32>
    %38 = arith.mulf %7, %14 : vector<2x4x1xf32>
    %39 = vector.broadcast %28 : f32 to vector<2x4x1xf32>
    %40 = arith.mulf %39, %38 : vector<2x4x1xf32>
    %cst_19 = arith.constant 1.000000e+00 : f32
    %41 = arith.subf %cst_19, %28 : f32
    %42 = arith.mulf %20, %27 : vector<2x1x1xf32>
    %43 = vector.broadcast %41 : f32 to vector<2x1x1xf32>
    %44 = arith.mulf %43, %42 : vector<2x1x1xf32>
    %45 = vector.broadcast %44 : vector<2x1x1xf32> to vector<2x4x1xf32>
    %46 = arith.addf %40, %45 : vector<2x4x1xf32>
    %47 = arith.mulf %29, %37 : vector<2x4x1xf32>
    %48 = arith.mulf %29, %46 : vector<2x4x1xf32>
    %49 = arith.subf %30, %48 : vector<2x4x1xf32>
    %c0_20 = arith.constant 0 : index
    %c0_21 = arith.constant 0 : index
    %c0_22 = arith.constant 0 : index
    %50 = vector.load %arg2[%c0_20, %c0_21, %c0_22] : memref<2x4x256xf32, #tpu.memory_space<vmem>>, vector<2x4x256xf32>
    %51 = vector.broadcast %47 : vector<2x4x1xf32> to vector<2x4x256xf32>
    %52 = arith.mulf %50, %51 : vector<2x4x256xf32>
    %53 = vector.broadcast %49 : vector<2x4x1xf32> to vector<2x4x256xf32>
    %54 = arith.addf %52, %53 : vector<2x4x256xf32>
    %c0_23 = arith.constant 0 : index
    %c0_24 = arith.constant 0 : index
    %c0_25 = arith.constant 0 : index
    %55 = vector.load %arg5[%c0_23, %c0_24, %c0_25] : memref<2x4x256xf32, #tpu.memory_space<vmem>>, vector<2x4x256xf32>
    tpu.vector_store %arg5[%c0_23, %c0_24, %c0_25], %54 {strides = array<i32>} : memref<2x4x256xf32, #tpu.memory_space<vmem>>, vector<2x4x256xf32>,
    return
  }
  func.func @transform_0(%arg0: i32) -> i32 {
    %c0_i32 = arith.constant 0 : i32
    %c0_i32_0 = arith.constant 0 : i32
    return %c0_i32 : i32
  }
  func.func @transform_1(%arg0: i32) -> (i32, i32, i32) {
    %c0_i32 = arith.constant 0 : i32
    %c0_i32_0 = arith.constant 0 : i32
    %c0_i32_1 = arith.constant 0 : i32
    return %arg0, %c0_i32, %c0_i32_0 : i32, i32, i32
  }
  func.func @transform_2(%arg0: i32) -> (i32, i32, i32) {
    %c0_i32 = arith.constant 0 : i32
    %c0_i32_0 = arith.constant 0 : i32
    %c0_i32_1 = arith.constant 0 : i32
    return %arg0, %c0_i32, %c0_i32_0 : i32, i32, i32
  }
  func.func @transform_3(%arg0: i32) -> (i32, i32, i32) {
    %c0_i32 = arith.constant 0 : i32
    %c0_i32_0 = arith.constant 0 : i32
    %c0_i32_1 = arith.constant 0 : i32
    return %arg0, %c0_i32, %c0_i32_0 : i32, i32, i32
  }
  func.func @transform_4(%arg0: i32) -> (i32, i32, i32) {
    %c0_i32 = arith.constant 0 : i32
    %c0_i32_0 = arith.constant 0 : i32
    %c0_i32_1 = arith.constant 0 : i32
    return %arg0, %c0_i32, %c0_i32_0 : i32, i32, i32
  }
}

</mosaic_0001>

<bundles_post_ra>
// kernel: tpu_custom_call.1
= control target key start
LH: loop header
LB: loop body
LE: loop exit
PB: predicated region body
PF: predicated region fallthrough
CT: control target
= control target key end

     0   :  { %s387_s0 = inlined_call_operand.<no memory space> [shape: f32[1], index: 0, kind: input, shape index: {}]   ;;  %s388_s1 = inlined_call_operand.vmem [shape: f32[2,4,256], index: 1, kind: input, shape index: {}]   ;;  %s389_s2 = inlined_call_operand.vmem [shape: f32[2,4,1], index: 2, kind: input, shape index: {}]   ;;  %s390_s3 = inlined_call_operand.vmem [shape: f32[2,4,1], index: 3, kind: input, shape index: {}]   ;;  %s391_s4 = inlined_call_operand.hbm [shape: f32[2,4,256], index: 4, kind: output, shape index: {}]  }
   0x1   :  { %v323_v0 = vld [vmem:[%s388_s1] sm:$0xff]  ;;  %v328_v1 = vld [vmem:[%s388_s1 + $0x8] sm:$0xff] }
   0x2   :  { %10 = vsyncpa [#allocation4], 0  ;;  %23 = vst [vmem:[#allocation1] ss:$2 sm:$0xff] %v323_v0  ;;  %v45_v2 = vmul.f32 %v323_v0, %v323_v0  ;;  %vm34_vm0 = vcmask 1043456   ;;  %v46_v3 = vmul.f32 %v328_v1, %v328_v1  ;;  %v290_v49 = vmov 0  }
   0x3   :  { %27 = vst [vmem:[#allocation1 + $0x10] ss:$2 sm:$0xff] %v328_v1  ;;  %253 = vset.pattern.permute.xlu2 %v290_v49  ;;  %254 = vset.pattern.permute.xlu0 %v290_v49  ;;  %s166_s20 = ssub.f32 1.0, %s387_s0  ;;  %s236_s6 = sshll.u32 %s391_s4, 4  ;;  %s237_s6 = int_to_ptr.hbm [resolvable:$true] %s236_s6 }
   0x4   :  { %255 = vset.pattern.permute.xlu1 %v290_v49  ;;  %s293_s7 = smov 128   ;;  %s294_s8 = smov 8  }
   0x9   :  { %v24_v4 = vld.sshfl [vmem:[#allocation1] sm:$0xff pattern:$0x75316420]  ;;  %v25_v5 = vld.sshfl [vmem:[#allocation1 + $0x8] sm:$0xff pattern:$0x75316420] }
   0xa   :  { %v35_v6 = vsel %vm34_vm0, %v24_v4, 0.0  ;;  %v36_v7 = vsel %vm34_vm0, %v25_v5, 0.0  ;;  %49 = vst [vmem:[#allocation1] ss:$2 sm:$0xff] %v45_v2 }
   0xb   :  { %v37_v8 = vadd.f32 %v36_v7, %v35_v6  ;;  %v28_v9 = vld.sshfl [vmem:[#allocation1 + $0x10] sm:$0xff pattern:$0x75316420]  ;;  %v29_v10 = vld.sshfl [vmem:[#allocation1 + $0x18] sm:$0xff pattern:$0x75316420] }
   0xc   :  { %53 = vst [vmem:[#allocation1 + $0x10] ss:$2 sm:$0xff] %v46_v3  ;;  %v40_v11 = vsel %vm34_vm0, %v28_v9, 0.0  ;;  %v41_v12 = vsel %vm34_vm0, %v29_v10, 0.0 }
   0xd   :  { %38 = vadd.xlane.f32.xlu0 %v37_v8  ;;  %v42_v15 = vadd.f32 %v41_v12, %v40_v11 }
  0x11   :  { %v50_v13 = vld.sshfl [vmem:[#allocation1] sm:$0xff pattern:$0x75316420]  ;;  %v51_v14 = vld.sshfl [vmem:[#allocation1 + $0x8] sm:$0xff pattern:$0x75316420] }
  0x12   :  { %v60_v16 = vsel %vm34_vm0, %v50_v13, 0.0  ;;  %v61_v17 = vsel %vm34_vm0, %v51_v14, 0.0 }
  0x13   :  { %v62_v18 = vadd.f32 %v61_v17, %v60_v16  ;;  %v54_v19 = vld.sshfl [vmem:[#allocation1 + $0x10] sm:$0xff pattern:$0x75316420]  ;;  %v55_v20 = vld.sshfl [vmem:[#allocation1 + $0x18] sm:$0xff pattern:$0x75316420] }
  0x14   :  { %v65_v21 = vsel %vm34_vm0, %v54_v19, 0.0  ;;  %v66_v22 = vsel %vm34_vm0, %v55_v20, 0.0 }
  0x15   :  { %63 = vadd.xlane.f32.xlu1 %v62_v18  ;;  %43 = vadd.xlane.f32.xlu0 %v42_v15  ;;  %v67_v23 = vadd.f32 %v66_v22, %v65_v21 }
  0x1d   :  { %68 = vadd.xlane.f32.xlu1 %v67_v23 }
  0x80   :  { %v39_v24 = vpop.xlane.xlu0 %38 }
  0x81   :  { %v100_v25 = vsel %vm34_vm0, %v39_v24, 0.0  ;;  %v345_v27 = vmul.f32 0.00390625, %v39_v24 }
  0x82   :  { %v101_v26 = vrot.slane %v100_v25, 4 }
  0x83   :  { %v72_v30 = vmul.f32 %v345_v27, %v39_v24 }
  0x84   :  { %v102_v28 = vadd.f32 %v101_v26, %v100_v25 }
  0x86   :  { %v103_v29 = vrot.slane %v102_v28, 2 }
  0x88   :  { %v104_v31 = vadd.f32 %v103_v29, %v102_v28  ;;  %v64_v32 = vpop.xlane.xlu1 %63  ;;  %v44_v33 = vpop.xlane.xlu0 %43 }
  0x89   :  { %v74_v34 = vsub.f32 %v64_v32, %v72_v30  ;;  %v114_v35 = vsel %vm34_vm0, %v64_v32, 0.0  ;;  %v107_v36 = vsel %vm34_vm0, %v44_v33, 0.0  ;;  %v350_v41 = vmul.f32 0.00390625, %v44_v33 }
  0x8a   :  { %v105_v37 = vrot.slane %v104_v31, 1  ;;  %v115_v38 = vrot.slane %v114_v35, 4  ;;  %v108_v39 = vrot.slane %v107_v36, 4 }
  0x8b   :  { %v76_v40 = vmul.f32 0.003921569, %v74_v34  ;;  %v73_v48 = vmul.f32 %v350_v41, %v44_v33 }
  0x8c   :  { %v106_v42 = vadd.f32 %v105_v37, %v104_v31  ;;  %v116_v43 = vadd.f32 %v115_v38, %v114_v35  ;;  %v109_v44 = vadd.f32 %v108_v39, %v107_v36  ;;  %v163_v35 = vstv %s387_s0 }
  0x8d   :  { %v78_v45 = vadd.f32 1e-06, %v76_v40  ;;  %v167_v36 = vstv %s166_s20 }
  0x8e   :  { %v117_v46 = vrot.slane %v116_v43, 2  ;;  %v110_v47 = vrot.slane %v109_v44, 2  ;;  %v353_v50 = vmul.f32 0.0009765625, %v106_v42 }
  0x8f   :  { %256 = vrsqrt.f32 %v78_v45  ;;  %vm86_vm2 = vweird.f32 %v78_v45 }
  0x90   :  { %v118_v51 = vadd.f32 %v117_v46, %v116_v43  ;;  %v111_v52 = vadd.f32 %v110_v47, %v109_v44  ;;  %v69_v53 = vpop.xlane.xlu1 %68  ;;  %v130_v60 = vmul.f32 %v353_v50, %v106_v42  ;;  %v159_v46 = vld [vmem:[%s389_s2] sm:$0xf] }
  0x91   :  { %v75_v54 = vsub.f32 %v69_v53, %v73_v48  ;;  %v121_v55 = vsel %vm34_vm0, %v69_v53, 0.0 }
  0x92   :  { %v119_v56 = vrot.slane %v118_v51, 1  ;;  %v112_v57 = vrot.slane %v111_v52, 1  ;;  %v122_v58 = vrot.slane %v121_v55, 4 }
  0x93   :  { %v77_v59 = vmul.f32 0.003921569, %v75_v54 }
  0x94   :  { %v120_v61 = vadd.f32 %v119_v56, %v118_v51  ;;  %v123_v62 = vadd.f32 %v122_v58, %v121_v55  ;;  %v113_v2 = vadd.f32 %v112_v57, %v111_v52  ;;  %v161_v55 = vld [vmem:[%s390_s3] sm:$0xf] }
  0x95   :  { %v257_v63 = vpop.eup %256  ;;  %v79_v3 = vadd.f32 1e-06, %v77_v59 }
  0x96   :  { %v81_v4 = vmul.f32 %v257_v63, %v78_v45  ;;  %v132_v5 = vsub.f32 %v120_v61, %v130_v60  ;;  %v124_v6 = vrot.slane %v123_v62, 2  ;;  %v357_v9 = vmul.f32 0.0009765625, %v113_v2 }
  0x97   :  { %258 = vrsqrt.f32 %v79_v3  ;;  %vm87_vm1 = vweird.f32 %v257_v63  ;;  %vm96_vm8 = vweird.f32 %v79_v3 }
  0x98   :  { %v134_v7 = vmul.f32 0.0009775171, %v132_v5  ;;  %v82_v8 = vmul.f32 %v257_v63, %v81_v4  ;;  %v125_v10 = vadd.f32 %v124_v6, %v123_v62  ;;  %v131_v15 = vmul.f32 %v357_v9, %v113_v2  ;;  %vm88_vm3 = vmor %vm86_vm2, %vm87_vm1 }
  0x9a   :  { %v136_v11 = vadd.f32 1e-06, %v134_v7  ;;  %v126_v12 = vrot.slane %v125_v10, 1  ;;  %v83_v14 = vmul.f32 0.5, %v82_v8 }
  0x9c   :  { %260 = vrsqrt.f32 %v136_v11  ;;  %v127_v16 = vadd.f32 %v126_v12, %v125_v10  ;;  %v84_v19 = vsub.f32 1.5, %v83_v14  ;;  %vm144_vm5 = vweird.f32 %v136_v11 }
  0x9d   :  { %v259_v13 = vpop.eup %258  ;;  %v291_v10 = vmov 839922192  }
  0x9e   :  { %v91_v17 = vmul.f32 %v259_v13, %v79_v3  ;;  %v133_v18 = vsub.f32 %v127_v16, %v131_v15  ;;  %v85_v26 = vmul.f32 %v257_v63, %v84_v19  ;;  %vm97_vm7 = vweird.f32 %v259_v13 }
  0x9f   :  { %vm98_vm9 = vmor %vm96_vm8, %vm97_vm7 }
  0xa0   :  { %v92_v20 = vmul.f32 %v259_v13, %v91_v17  ;;  %v135_v21 = vmul.f32 0.0009775171, %v133_v18  ;;  %v89_v31 = vsel %vm88_vm3, %v257_v63, %v85_v26  ;;  %v160_v63 = vld [vmem:[%s389_s2 + $0x4] sm:$0xf]  ;;  %s292_s2 = smov [#allocation3]  }
  0xa1   :  { %v172_v38 = vmul.f32 %v89_v31, %v345_v27  ;;  %v164_v43 = vmul.f32 %v163_v35, %v89_v31  ;;  %s234_s30 = sshll.u32 %s292_s2, 4  ;;  %s235_s30 = int_to_ptr.vmem [resolvable:$true] %s234_s30 }
  0xa2   :  { %v261_v22 = vpop.eup %260  ;;  %v137_v24 = vadd.f32 1e-06, %v135_v21  ;;  %v93_v25 = vmul.f32 0.5, %v92_v20 }
  0xa3   :  { %v139_v23 = vmul.f32 %v261_v22, %v136_v11  ;;  %vm145_vm4 = vweird.f32 %v261_v22  ;;  %v174_v48 = vmul.f32 %v172_v38, %v163_v35 }
  0xa4   :  { %262 = vrsqrt.f32 %v137_v24  ;;  %v94_v30 = vsub.f32 1.5, %v93_v25  ;;  %vm146_vm6 = vmor %vm144_vm5, %vm145_vm4  ;;  %vm154_vm11 = vweird.f32 %v137_v24 }
  0xa5   :  { %v140_v28 = vmul.f32 %v261_v22, %v139_v23 }
  0xa6   :  { %v95_v39 = vmul.f32 %v259_v13, %v94_v30 }
  0xa7   :  { %v141_v29 = vmul.f32 0.5, %v140_v28 }
  0xa8   :  { %v99_v52 = vsel %vm98_vm9, %v259_v13, %v95_v39 }
  0xa9   :  { %v142_v32 = vsub.f32 1.5, %v141_v29  ;;  %v173_v57 = vmul.f32 %v99_v52, %v350_v41  ;;  %v165_v60 = vmul.f32 %v163_v35, %v99_v52  ;;  %v162_v41 = vld [vmem:[%s390_s3 + $0x4] sm:$0xf] }
  0xaa   :  { %v263_v33 = vpop.eup %262 }
  0xab   :  { %v143_v34 = vmul.f32 %v261_v22, %v142_v32  ;;  %v149_v37 = vmul.f32 %v263_v33, %v137_v24  ;;  %vm155_vm10 = vweird.f32 %v263_v33  ;;  %v175_v3 = vmul.f32 %v173_v57, %v163_v35 }
  0xac   :  { %vm156_vm12 = vmor %vm154_vm11, %vm155_vm10 }
  0xad   :  { %v147_v40 = vsel %vm146_vm6, %v261_v22, %v143_v34  ;;  %v150_v42 = vmul.f32 %v263_v33, %v149_v37 }
  0xae   :  { %v168_v44 = vmul.f32 %v167_v36, %v147_v40  ;;  %v176_v45 = vmul.f32 %v147_v40, %v353_v50 }
  0xaf   :  { %v151_v51 = vmul.f32 0.5, %v150_v42 }
  0xb0   :  { %v170_v47 = vadd.f32 %v168_v44, %v164_v43  ;;  %v178_v49 = vmul.f32 %v176_v45, %v167_v36 }
  0xb1   :  { %v152_v54 = vsub.f32 1.5, %v151_v51 }
  0xb2   :  { %v180_v27 = vadd.f32 %v178_v49, %v174_v48  ;;  %v182_v53 = vmul.f32 %v170_v47, %v159_v46 }
  0xb3   :  { %v153_v56 = vmul.f32 %v263_v33, %v152_v54 }
  0xb4   :  { %v184_v50 = vmul.f32 %v180_v27, %v159_v46  ;;  %190 = vperm.xlu2 %253, %v182_v53  }
  0xb5   :  { %v157_v59 = vsel %vm156_vm12, %v263_v33, %v153_v56 }
  0xb6   :  { %v186_v58 = vsub.f32 %v161_v55, %v184_v50  ;;  %v169_v61 = vmul.f32 %v167_v36, %v157_v59  ;;  %v177_v62 = vmul.f32 %v157_v59, %v357_v9  ;;  %v197_v9 = vunpack.c.l.s4 %v291_v10 }
  0xb8   :  { %210 = vperm.xlu0 %254, %v186_v58   ;;  %v171_v2 = vadd.f32 %v169_v61, %v165_v60  ;;  %v179_v4 = vmul.f32 %v177_v62, %v167_v36  ;;  %v198_v11 = vunpack.c.0.s8 %v197_v9 }
  0xba   :  { %v183_v5 = vmul.f32 %v171_v2, %v160_v63  ;;  %v181_v6 = vadd.f32 %v179_v4, %v175_v3 }
  0xbc   :  { %194 = vperm.xlu2 %253, %v183_v5   ;;  %v185_v7 = vmul.f32 %v181_v6, %v160_v63 }
  0xbe   :  { %v187_v8 = vsub.f32 %v162_v41, %v185_v7 }
  0xc0   :  { %214 = vperm.xlu1 %255, %v187_v8  }
 0x10e   :  { %v191_v12 = vpop.permute.xlu2 %190 }
 0x10f   :  { %v199_v13 = vperm.slane %v191_v12, %v198_v11 }
 0x111   :  { %v206_v15 = vmul.f32 %v199_v13, %v323_v0 }
 0x116   :  { %v195_v17 = vpop.permute.xlu2 %194 }
 0x117   :  { %v203_v19 = vperm.slane %v195_v17, %v198_v11 }
 0x119   :  { %v207_v21 = vmul.f32 %v203_v19, %v328_v1 }
 0x12a   :  { %v211_v14 = vpop.permute.xlu0 %210 }
 0x12b   :  { %v219_v16 = vperm.slane %v211_v14, %v198_v11 }
 0x12d   :  { %v226_v18 = vadd.f32 %v219_v16, %v206_v15 }
 0x12f   :  { %228 = vst [vmem:[#allocation3] sm:$0xff] %v226_v18 }
 0x132   :  { %v215_v20 = vpop.permute.xlu1 %214 }
 0x133   :  { %v223_v22 = vperm.slane %v215_v20, %v198_v11 }
 0x135   :  { %v227_v23 = vadd.f32 %v223_v22, %v207_v21 }
 0x137   :  { %229 = vst [vmem:[#allocation3 + $0x8] sm:$0xff] %v227_v23 }
 0x138   :  { %242 = dma.vmem_to_hbm [thread:$0]  %s235_s30, 256, %s237_s6, [#allocation4], %s293_s7, %s293_s7, %s294_s8  }
 0x139   :  { %288 = dma.done.wait [#allocation4], 256  }
 0x13a   :  { %289 = vsyncadd [#allocation4], 4294967040 }
 0x13b   :  { %247 = vsyncpa [#allocation4], 1 }

</bundles_post_ra>
